<compile_context>
chip_gen: v7x
topology: tpu7x:2x2x1
jax: 0.10.0
libtpu: 0.0.40
codegen_flags: <defaults>
</compile_context>

<pallas_src>
import jax
import jax.numpy as jnp
from jax.experimental import pallas as pl
from jax.experimental.pallas import tpu as pltpu

_LANE = 128  # TPU lane width; padded output width


def _round_up(x, m):
    return (x + m - 1) // m * m


def backbone_kernel(x_ref, w1_ref, b1_ref, w2_ref, b2_ref, out_ref):
    # x_ref : (TB, input_size)        w1_ref: (input_size, hidden_size)
    # b1_ref: (1, hidden_size)        w2_ref: (hidden_size, LANE)  (lane-padded)
    # b2_ref: (1, LANE)               out_ref: (TB, LANE)          (lane-padded)
    x = x_ref[...]

    # dense1 + sigmoid  (exp lands on the EUP slot; jax.nn.sigmoid is robust)
    h = jnp.dot(x, w1_ref[...], preferred_element_type=jnp.float32)
    h = jax.nn.sigmoid(h + b1_ref[...])

    # dense2 + sigmoid (lane-dense 128-wide output block -> unmasked vst)
    o = jnp.dot(h, w2_ref[...], preferred_element_type=jnp.float32)
    o = jax.nn.sigmoid(o + b2_ref[...])

    out_ref[...] = o.astype(out_ref.dtype)


def backbone_forward(x, w1, b1, w2, b2, *, block_b=512):
    """Forward pass of Backbone.

    x : (B, input_size) f32
    w1: (input_size, hidden_size)   b1: (1, hidden_size)
    w2: (hidden_size, latent_size)  b2: (1, latent_size)
    Returns (B, latent_size) f32.
    """
    B, input_size = x.shape
    hidden_size = w1.shape[1]
    latent_size = w2.shape[1]
    assert latent_size <= _LANE, "latent padding assumes latent_size <= 128"

    # --- lane-dense output: pad second layer's output dim to 128 lanes ------
    w2p = jnp.zeros((hidden_size, _LANE), w2.dtype).at[:, :latent_size].set(w2)
    b2p = jnp.zeros((1, _LANE), b2.dtype).at[:, :latent_size].set(b2)

    # --- batch tiling: multiple of 8 sublanes, pad B up to a tile multiple --
    tb = min(block_b, _round_up(B, 8))
    tb = _round_up(tb, 8)
    Bp = _round_up(B, tb)
    if Bp != B:
        x = jnp.pad(x, ((0, Bp - B), (0, 0)))

    grid = (Bp // tb,)

    out_padded = pl.pallas_call(
        backbone_kernel,
        out_shape=jax.ShapeDtypeStruct((Bp, _LANE), jnp.float32),
        grid=grid,
        in_specs=[
            # activation tile: marches down the batch axis (double-buffered)
            pl.BlockSpec((tb, input_size), lambda i: (i, 0)),
            # weights / biases: same block every step -> resident in VMEM
            pl.BlockSpec((input_size, hidden_size), lambda i: (0, 0)),
            pl.BlockSpec((1, hidden_size), lambda i: (0, 0)),
            pl.BlockSpec((hidden_size, _LANE), lambda i: (0, 0)),
            pl.BlockSpec((1, _LANE), lambda i: (0, 0)),
        ],
        out_specs=pl.BlockSpec((tb, _LANE), lambda i: (i, 0)),
        compiler_params=pltpu.CompilerParams(
            dimension_semantics=("parallel",),      # shard batch tiles across TCs (v7x)
            vmem_limit_bytes=32 * 1024 * 1024,      # safe on v7x's 64 MiB physical VMEM
        ),
    )(x, w1, b1, w2p, b2p)

    return out_padded[:B, :latent_size]


def init_params(key, input_size=4, hidden_size=10, latent_size=2):
    """Deterministic init mimicking torch.nn.Linear (uniform +/- 1/sqrt(fan_in))."""
    k1, k2, k3, k4 = jax.random.split(key, 4)
    bound1 = 1.0 / jnp.sqrt(input_size)
    bound2 = 1.0 / jnp.sqrt(hidden_size)
    # Stored as (in_features, out_features) == transpose of PyTorch's (out, in).
    w1 = jax.random.uniform(k1, (input_size, hidden_size), jnp.float32, -bound1, bound1)
    b1 = jax.random.uniform(k2, (1, hidden_size), jnp.float32, -bound1, bound1)
    w2 = jax.random.uniform(k3, (hidden_size, latent_size), jnp.float32, -bound2, bound2)
    b2 = jax.random.uniform(k4, (1, latent_size), jnp.float32, -bound2, bound2)
    return w1, b1, w2, b2


if __name__ == "__main__":
    key = jax.random.PRNGKey(0)
    kx, kp = jax.random.split(key)

    batch, input_size, hidden_size, latent_size = 8, 4, 10, 2
    x = jax.random.normal(kx, (batch, input_size), jnp.float32)
    w1, b1, w2, b2 = init_params(kp, input_size, hidden_size, latent_size)

    out = backbone_forward(x, w1, b1, w2, b2)
    out = jax.block_until_ready(out)

    # Reference check in plain JAX (same math as the PyTorch module).
    ref = jax.nn.sigmoid(jax.nn.sigmoid(x @ w1 + b1) @ w2 + b2)
    assert out.shape == (batch, latent_size)
    assert jnp.allclose(out, ref, atol=1e-5, rtol=1e-5)

    # Also exercise a larger, non-tile-aligned batch to validate the grid path.
    xb = jax.random.normal(kx, (1000, input_size), jnp.float32)
    outb = jax.block_until_ready(backbone_forward(xb, w1, b1, w2, b2))
    refb = jax.nn.sigmoid(jax.nn.sigmoid(xb @ w1 + b1) @ w2 + b2)
    assert outb.shape == (1000, latent_size)
    assert jnp.allclose(outb, refb, atol=1e-5, rtol=1e-5)

    print("KERNEL_OK")
</pallas_src>

<mosaic_0001>
module attributes {stable_mosaic.version = 11 : i64} {
  func.func @backbone_kernel(%arg0: i32, %arg1: memref<8x4xf32, #tpu.memory_space<vmem>>, %arg2: memref<4x10xf32, #tpu.memory_space<vmem>>, %arg3: memref<1x10xf32, #tpu.memory_space<vmem>>, %arg4: memref<10x128xf32, #tpu.memory_space<vmem>>, %arg5: memref<1x128xf32, #tpu.memory_space<vmem>>, %arg6: memref<8x128xf32, #tpu.memory_space<vmem>>) attributes {dimension_semantics = [#tpu.dimension_semantics<parallel>], iteration_bounds = array<i64: 1>, scalar_prefetch = 0 : i64, scratch_operands = 0 : i64, tpu.core_type = #tpu.core_type<tc>, window_params = [{transform_indices = @transform_0, window_bounds = array<i64: 8, 4>}, {pipeline_mode = #tpu.pipeline_mode<synchronous>, transform_indices = @transform_1, window_bounds = array<i64: 4, 10>}, {pipeline_mode = #tpu.pipeline_mode<synchronous>, transform_indices = @transform_2, window_bounds = array<i64: 1, 10>}, {pipeline_mode = #tpu.pipeline_mode<synchronous>, transform_indices = @transform_3, window_bounds = array<i64: 10, 128>}, {pipeline_mode = #tpu.pipeline_mode<synchronous>, transform_indices = @transform_4, window_bounds = array<i64: 1, 128>}, {transform_indices = @transform_5, window_bounds = array<i64: 8, 128>}]} {
    %c0 = arith.constant 0 : index
    %c0_0 = arith.constant 0 : index
    %0 = vector.load %arg1[%c0, %c0_0] : memref<8x4xf32, #tpu.memory_space<vmem>>, vector<8x4xf32>
    %c0_1 = arith.constant 0 : index
    %c0_2 = arith.constant 0 : index
    %1 = vector.load %arg2[%c0_1, %c0_2] : memref<4x10xf32, #tpu.memory_space<vmem>>, vector<4x10xf32>
    %cst = arith.constant dense<0.000000e+00> : vector<8x10xf32>
    %2 = tpu.matmul %0, %1, %cst {dimension_numbers = #tpu.dot_dimension_numbers<[1], [0], [0], [1], [0, 0, 1, 1], [], []>} : vector<8x4xf32>, vector<4x10xf32>, vector<8x10xf32> -> vector<8x10xf32>
    %c0_3 = arith.constant 0 : index
    %c0_4 = arith.constant 0 : index
    %3 = vector.load %arg3[%c0_3, %c0_4] : memref<1x10xf32, #tpu.memory_space<vmem>>, vector<1x10xf32>
    %4 = vector.broadcast %3 : vector<1x10xf32> to vector<8x10xf32>
    %5 = arith.addf %2, %4 : vector<8x10xf32>
    %6 = arith.negf %5 : vector<8x10xf32>
    %7 = math.exp %6 : vector<8x10xf32>
    %cst_5 = arith.constant 1.000000e+00 : f32
    %8 = vector.broadcast %cst_5 : f32 to vector<8x10xf32>
    %9 = arith.addf %8, %7 : vector<8x10xf32>
    %10 = arith.divf %8, %9 : vector<8x10xf32>
    %c0_6 = arith.constant 0 : index
    %c0_7 = arith.constant 0 : index
    %11 = vector.load %arg4[%c0_6, %c0_7] : memref<10x128xf32, #tpu.memory_space<vmem>>, vector<10x128xf32>
    %cst_8 = arith.constant dense<0.000000e+00> : vector<8x128xf32>
    %12 = tpu.matmul %10, %11, %cst_8 {dimension_numbers = #tpu.dot_dimension_numbers<[1], [0], [0], [1], [0, 0, 1, 1], [], []>} : vector<8x10xf32>, vector<10x128xf32>, vector<8x128xf32> -> vector<8x128xf32>
    %c0_9 = arith.constant 0 : index
    %c0_10 = arith.constant 0 : index
    %13 = vector.load %arg5[%c0_9, %c0_10] : memref<1x128xf32, #tpu.memory_space<vmem>>, vector<1x128xf32>
    %14 = vector.broadcast %13 : vector<1x128xf32> to vector<8x128xf32>
    %15 = arith.addf %12, %14 : vector<8x128xf32>
    %16 = arith.negf %15 : vector<8x128xf32>
    %17 = math.exp %16 : vector<8x128xf32>
    %cst_11 = arith.constant 1.000000e+00 : f32
    %18 = vector.broadcast %cst_11 : f32 to vector<8x128xf32>
    %19 = arith.addf %18, %17 : vector<8x128xf32>
    %20 = arith.divf %18, %19 : vector<8x128xf32>
    %c0_12 = arith.constant 0 : index
    %c0_13 = arith.constant 0 : index
    %21 = vector.load %arg6[%c0_12, %c0_13] : memref<8x128xf32, #tpu.memory_space<vmem>>, vector<8x128xf32>
    tpu.vector_store %arg6[%c0_12, %c0_13], %20 {strides = array<i32>} : memref<8x128xf32, #tpu.memory_space<vmem>>, vector<8x128xf32>,
    return
  }
  func.func @transform_0(%arg0: i32) -> (i32, i32) {
    %c0_i32 = arith.constant 0 : i32
    %c0_i32_0 = arith.constant 0 : i32
    return %arg0, %c0_i32 : i32, i32
  }
  func.func @transform_1(%arg0: i32) -> (i32, i32) {
    %c0_i32 = arith.constant 0 : i32
    %c0_i32_0 = arith.constant 0 : i32
    %c0_i32_1 = arith.constant 0 : i32
    return %c0_i32, %c0_i32_0 : i32, i32
  }
  func.func @transform_2(%arg0: i32) -> (i32, i32) {
    %c0_i32 = arith.constant 0 : i32
    %c0_i32_0 = arith.constant 0 : i32
    %c0_i32_1 = arith.constant 0 : i32
    return %c0_i32, %c0_i32_0 : i32, i32
  }
  func.func @transform_3(%arg0: i32) -> (i32, i32) {
    %c0_i32 = arith.constant 0 : i32
    %c0_i32_0 = arith.constant 0 : i32
    %c0_i32_1 = arith.constant 0 : i32
    return %c0_i32, %c0_i32_0 : i32, i32
  }
  func.func @transform_4(%arg0: i32) -> (i32, i32) {
    %c0_i32 = arith.constant 0 : i32
    %c0_i32_0 = arith.constant 0 : i32
    %c0_i32_1 = arith.constant 0 : i32
    return %c0_i32, %c0_i32_0 : i32, i32
  }
  func.func @transform_5(%arg0: i32) -> (i32, i32) {
    %c0_i32 = arith.constant 0 : i32
    %c0_i32_0 = arith.constant 0 : i32
    return %arg0, %c0_i32 : i32, i32
  }
}

</mosaic_0001>

<bundles_post_ra>
// kernel: tpu_custom_call.1
= control target key start
LH: loop header
LB: loop body
LE: loop exit
PB: predicated region body
PF: predicated region fallthrough
CT: control target
= control target key end

     0   :  { %vm34_vm0 = vcmask 1043456   ;;  %v288_v2 = vmov 0.0   ;;  %vm289_vm1 = vmmov 0   ;;  %vm30_vm2 = vcmask 31744   ;;  %s353_s0 = inlined_call_operand.vmem [shape: f32[8,4], index: 0, kind: input, shape index: {}]   ;;  %s354_s1 = inlined_call_operand.vmem [shape: f32[4,10], index: 1, kind: input, shape index: {}]   ;;  %s355_s2 = inlined_call_operand.vmem [shape: f32[1,10], index: 2, kind: input, shape index: {}]   ;;  %s356_s3 = inlined_call_operand.vmem [shape: f32[10,128], index: 3, kind: input, shape index: {}]   ;;  %s357_s4 = inlined_call_operand.vmem [shape: f32[1,128], index: 4, kind: input, shape index: {}]   ;;  %s358_s5 = inlined_call_operand.hbm [shape: f32[8,128], index: 5, kind: output, shape index: {}]  }
   0x1   :  { %v22_v0 = vld [vmem:[%s354_s1] sm:$0xf]  ;;  %235 = vmatprep.subr.mxu0 %v288_v2  ;;  %237 = vmatprep.mubr.msk.f32.mxu0 %vm289_vm1, %v288_v2 }
   0x2   :  { %v21_v1 = vld [vmem:[%s353_s0] sm:$0xff] }
   0x3   :  { %10 = vsyncpa [#allocation3], 0  ;;  %236 = vmatpush3.msk.msra.mxu0 %vm34_vm0, %v22_v0  ;;  %244 = vmatprep.mubr.msk.f32.mxu1 %vm289_vm1, %v288_v2  ;;  %v114_v3 = vld [vmem:[%s356_s3] sm:$0xff]  ;;  %v115_v4 = vld [vmem:[%s356_s3 + $0x8] sm:$0x3]  ;;  %vm127_vm3 = vcmask 1041408  }
   0x4   :  { %238 = vmatmul.mubr.msk.f32.vlgmr.msra.gmra.mrb[0].mxu0 %vm30_vm2, %v21_v1  ;;  %v290_v5 = vmov 0.0|0.0   ;;  %v248_v6 = vpack.c.bf16 %v115_v4, %v114_v3  ;;  %vm291_vm4 = vmmov 1   ;;  %v222_v7 = vld [vmem:[%s355_s2] ss:$0 sm:$0xff]  ;;  %vm123_vm6 = vcmask 80896   ;;  %s292_s2 = smov [#allocation2]  }
   0x5   :  { %247 = vmatprep.subr.bf16.mxu1 %v290_v5  ;;  %vm249_vm5 = vmpackc.low %vm127_vm3, %vm291_vm4  ;;  %v226_v15 = vld [vmem:[%s357_s4] ss:$0 sm:$0xff]  ;;  %s214_s27 = sshll.u32 %s292_s2, 4  ;;  %s215_s27 = int_to_ptr.vmem [resolvable:$true] %s214_s27 }
   0x6   :  { %250 = vmatpush3.bf16.msk.msra.mxu1 %vm249_vm5, %v248_v6  ;;  %s264_s28 = scalar_lea.vmem %s215_s27, 128  ;;  %p269_p1 = scmp.lt.s32.totalorder %s215_s27, %s215_s27 }
   0x7   :  { %p265_p0 = scmp.ne.s32.totalorder %s215_s27, %s264_s28  ;;  %p270_p2 = scmp.lt.s32.totalorder %s264_s28, %s264_s28 }
   0x9   :  { %p271_p3 = por %p270_p2, %p269_p1 }
   0xb   :  { %p272_p4 = pnand %p271_p3, %p265_p0 }
  0xd7   :  { %v104_v8 = vpop.f32.mrb[0].mxu0 }
  0xd8   :  { %v105_v9 = vadd.f32 %v222_v7, %v104_v8  ;;  %v239_v10 = vpop.f32.mrb[1].mxu0 }
  0xda   :  { %v225_v11 = vmul.f32 -1.442695, %v105_v9 }
  0xdc   :  { %256 = vpow2.f32 %v225_v11 }
  0xe6   :  { %v257_v12 = vpop.eup %256 }
  0xe7   :  { %v111_v13 = vadd.f32 1.0, %v257_v12 }
  0xe9   :  { %258 = vrcp.f32 %v111_v13 }
  0xf3   :  { %v259_v14 = vpop.eup %258 }
  0xf4   :  { %245 = vmatmul.mubr.msk.f32.vlgmr.msra.gmra.mrb[0].mxu1 %vm123_vm6, %v259_v14 }
 0x1c7   :  { %v197_v16 = vpop.f32.mrb[0].mxu1 }
 0x1c8   :  { %v198_v17 = vadd.f32 %v226_v15, %v197_v16  ;;  %v246_v18 = vpop.f32.mrb[1].mxu1 }
 0x1ca   :  { %v229_v19 = vmul.f32 -1.442695, %v198_v17 }
 0x1cc   :  { %260 = vpow2.f32 %v229_v19 }
 0x1d6   :  { %v261_v20 = vpop.eup %260 }
 0x1d7   :  { %v204_v21 = vadd.f32 1.0, %v261_v20 }
 0x1d9   :  { %262 = vrcp.f32 %v204_v21 }
 0x1e3   :  { %v263_v22 = vpop.eup %262 }
 0x1e4   :  { %207 = vst [vmem:[#allocation2] sm:$0xff] %v263_v22 }
 0x1e5   :  { %275 = shalt.err (!%p272_p4)
}
 0x1e6   :  { %s276_s30 = scalar_lea.hbm %s358_s5, 128 }
 0x1e7   :  { %p277_p5 = scmp.ne.s32.totalorder %s358_s5, %s276_s30  ;;  %p280_p6 = scmp.lt.u32.totalorder %s276_s30, %s358_s5 }
 0x1e9   :  { %p282_p7 = pnand %p280_p6, %p277_p5 }
 0x1eb   :  { %285 = shalt.err (!%p282_p7)
}
 0x1ec   :  { %217 = dma.vmem_to_hbm [thread:$0]  %s215_s27, 128, %s358_s5, [#allocation3]  }
 0x1ed   :  { %286 = dma.done.wait [#allocation3], 128  }
 0x1ee   :  { %287 = vsyncadd [#allocation3], 4294967168 }
 0x1ef   :  { %221 = vsyncpa [#allocation3], 1 }

</bundles_post_ra>
